<compile_context>
chip_gen: v5e
topology: v5e:2x2
jax: 0.10.0
libtpu: 0.0.40
codegen_flags: <defaults>
</compile_context>

<pallas_src>
import functools

import jax
import jax.numpy as jnp
from jax.experimental import pallas as pl
from jax.experimental.pallas import tpu as pltpu


_LANES = 128  # lane width; also the width of the halo side-blocks


def _vmem_limit_bytes():
    """Scoped-VMEM cap derived from the actual chip generation."""
    try:
        phys = int(pltpu.get_tpu_info().vmem_capacity_bytes)
    except Exception:
        phys = 64 * 1024 * 1024  # v7x-safe fallback
    # ~60% of physical: ~38 MiB on v7x (64 MiB), ~77 MiB on v5e/v6e (128 MiB).
    return max(32 * 1024 * 1024, min(int(phys * 0.6), 96 * 1024 * 1024))


def _pick_l_tile(L, B, C, K, vmem_limit):
    """Largest 128-aligned L tile that divides L and fits the VMEM budget."""
    # Rough bytes per L element per grid step: double-buffered main input and
    # output f32 streams, bf16 window/tap stack, f32 conv/bn/act/res temps.
    bytes_per_l = B * C * (48 + 2 * K)
    cap = max(_LANES, (vmem_limit // 2) // max(bytes_per_l, 1))
    for lt in (8192, 4096, 2048, 1024, 512, 256, 128):
        if lt <= cap and L % lt == 0:
            return lt
    return _LANES


def _window(prev_ref, main_ref, next_ref, t, n_tiles, left, cdtype):
    """Haloed conv window for global tile t: (B, C, l_tile + 2*left).

    The prev/next halo blocks have clamped index maps; at the sequence edges
    they are zero-masked so the conv sees the same zeros as padding='same'.
    Returns (window in matmul dtype, main block in f32 for the skip path).
    """
    x_main = main_ref[...]                                   # (B, C, Lt) f32
    not_first = (t > 0).astype(cdtype)
    not_last = (t < n_tiles - 1).astype(cdtype)
    lh = prev_ref[:, :, _LANES - left:].astype(cdtype) * not_first
    rh = next_ref[:, :, :left].astype(cdtype) * not_last
    win = jnp.concatenate([lh, x_main.astype(cdtype), rh], axis=-1)
    return win, x_main


def _dilated_conv(win, w2, dilation, l_tile, n_tap):
    """All K dilation taps and all batches folded into ONE wide-N matmul.

    win: (B, C, l_tile + (n_tap-1)*dilation), w2: (2C, K*C).
    Returns the conv output as (2C, B*l_tile) float32 (lane-dense N).
    """
    batch = win.shape[0]
    cols = []
    for b in range(batch):   # static; only assembles the (K*C, B*Lt) operand
        taps = [win[b, :, k * dilation:k * dilation + l_tile]
                for k in range(n_tap)]
        cols.append(jnp.concatenate(taps, axis=0))           # (K*C, Lt)
    xs = jnp.concatenate(cols, axis=1)                        # (K*C, B*Lt)
    # TODO(synk): for C >= ~32, stage xs through a VMEM scratch or switch to
    # K accumulating matmuls to bound vreg live ranges.
    return jnp.dot(w2, xs, preferred_element_type=jnp.float32)


def _stats_kernel(prev_ref, main_ref, next_ref, w2_ref, stats_ref, *,
                  dilation, l_tile, n_tap, n_tiles, tiles_per_par, left):
    """Phase 1: lane-dense partial sum / sum-of-squares of the conv output."""
    t = pl.program_id(0) * tiles_per_par + pl.program_id(1)

    @pl.when(pl.program_id(1) == 0)
    def _():
        stats_ref[...] = jnp.zeros_like(stats_ref)

    win, _ = _window(prev_ref, main_ref, next_ref, t, n_tiles, left,
                     w2_ref.dtype)
    conv = _dilated_conv(win, w2_ref[...], dilation, l_tile, n_tap)

    c2 = conv.shape[0]
    s = jnp.zeros((c2, _LANES), jnp.float32)
    ss = jnp.zeros((c2, _LANES), jnp.float32)
    for c in range(conv.shape[1] // _LANES):   # aligned static slices: VPU adds
        blk = conv[:, c * _LANES:(c + 1) * _LANES]
        s = s + blk
        ss = ss + blk * blk
    stats_ref[0, 0] = stats_ref[0, 0] + s
    stats_ref[0, 1] = stats_ref[0, 1] + ss


def _apply_kernel(prev_ref, main_ref, next_ref, w2_ref, scale_ref, shift_ref,
                  wres_ref, bres_ref, out_ref, *,
                  dilation, l_tile, n_tap, n_tiles, left, channels):
    """Phase 2: conv -> BN (global stats) -> gate -> 1x1 res conv + skip."""
    t = pl.program_id(0)
    win, x_skip = _window(prev_ref, main_ref, next_ref, t, n_tiles, left,
                          w2_ref.dtype)
    conv = _dilated_conv(win, w2_ref[...], dilation, l_tile, n_tap)  # (2C,B*Lt)
    bn = conv * scale_ref[...] + shift_ref[...]
    filt = bn[:channels, :]
    gate = bn[channels:, :]
    # sigmoid(g) == 0.5*(tanh(0.5*g)+1): one EUP op instead of exp+recip.
    act = jnp.tanh(filt) * (0.5 * (jnp.tanh(0.5 * gate) + 1.0))      # (C, B*Lt)
    res = jnp.dot(wres_ref[...], act.astype(wres_ref.dtype),
                  preferred_element_type=jnp.float32)                 # (C, B*Lt)
    bres = bres_ref[...]                                              # (C, 1)
    for b in range(x_skip.shape[0]):   # lane-aligned static slices per batch
        res_b = res[:, b * l_tile:(b + 1) * l_tile]
        out_ref[b] = (res_b + bres + x_skip[b]).astype(out_ref.dtype)


def wavenet_block(x_ncl, params, dilation, *, eps=1e-5, l_tile=None,
                  matmul_dtype=jnp.bfloat16):
    """Forward pass of WaveNetBlock; x_ncl: (B, C, L) f32 in PyTorch NCL layout."""
    B, C, L = x_ncl.shape
    w_conv = params['conv_w']                        # (2C, C, K)
    c2, _, K = w_conv.shape
    d = int(dilation)
    left = d * (K - 1) // 2                          # 'same' pad on each side
    assert (d * (K - 1)) % 2 == 0, "even receptive-field overhang required"
    assert 1 <= left <= _LANES, "dilation too large for 128-wide halo blocks"
    assert L % _LANES == 0, "sequence length must be a multiple of 128"

    vmem_limit = _vmem_limit_bytes()
    if l_tile is None:
        l_tile = _pick_l_tile(L, B, C, K, vmem_limit)
    assert L % l_tile == 0 and l_tile % _LANES == 0
    n_tiles = L // l_tile
    nb = l_tile // _LANES                            # lane blocks per tile
    n_lane_blocks = L // _LANES

    x = x_ncl.astype(jnp.float32)
    # Fold the K dilation taps into one (2C, K*C) matrix: column index k*C+c.
    w2 = jnp.transpose(w_conv, (0, 2, 1)).reshape(c2, K * C).astype(matmul_dtype)
    # NOTE: conv bias intentionally unused - training-mode BatchNorm subtracts
    # the per-channel batch mean, so a constant per-channel bias cancels.
    w_res = params['res_w'][:, :, 0].astype(matmul_dtype)             # (C, C)
    b_res = params['res_b'].reshape(C, 1).astype(jnp.float32)

    def _const_spec(shape, grid_rank):
        zeros = (0,) * len(shape)
        if grid_rank == 1:
            return pl.BlockSpec(shape, lambda i, _z=zeros: _z)
        return pl.BlockSpec(shape, lambda p, j, _z=zeros: _z)

    # ---- phase 1: global per-channel sum / sum-of-squares of the conv ------
    # Leading 'parallel' axis (size 2 when the tile count is even) lets both
    # v7x TensorCores own half the reduction; degenerate on v5e/v6e.
    n_par = 2 if (n_tiles % 2 == 0 and n_tiles >= 2) else 1
    tiles_per_par = n_tiles // n_par

    def main_map1(p, j):
        return (0, 0, p * tiles_per_par + j)

    def prev_map1(p, j):
        t = p * tiles_per_par + j
        return (0, 0, jnp.maximum(t * nb - 1, 0))

    def next_map1(p, j):
        t = p * tiles_per_par + j
        return (0, 0, jnp.minimum((t + 1) * nb, n_lane_blocks - 1))

    stats = pl.pallas_call(
        functools.partial(_stats_kernel, dilation=d, l_tile=l_tile, n_tap=K,
                          n_tiles=n_tiles, tiles_per_par=tiles_per_par,
                          left=left),
        grid=(n_par, tiles_per_par),
        in_specs=[pl.BlockSpec((B, C, _LANES), prev_map1),
                  pl.BlockSpec((B, C, l_tile), main_map1),
                  pl.BlockSpec((B, C, _LANES), next_map1),
                  _const_spec((c2, K * C), 2)],
        out_specs=pl.BlockSpec((1, 2, c2, _LANES), lambda p, j: (p, 0, 0, 0)),
        out_shape=jax.ShapeDtypeStruct((n_par, 2, c2, _LANES), jnp.float32),
        compiler_params=pltpu.CompilerParams(
            dimension_semantics=("parallel", "arbitrary"),
            vmem_limit_bytes=vmem_limit),
    )(x, x, x, w2)

    # Final 128-lane (and slab) reduction in the wrapper, in f32.
    sums = jnp.sum(stats, axis=(0, 3))               # (2, 2C)
    count = jnp.float32(B * L)
    mean = sums[0] / count
    # TODO(synk): E[x^2]-E[x]^2 is cancellation-prone for audio-scale B*L;
    # use a Welford-style per-tile combine if that regime matters.
    var = jnp.maximum(sums[1] / count - mean * mean, 0.0)
    inv_std = jax.lax.rsqrt(var + eps)
    scale = (params['bn_gamma'].astype(jnp.float32) * inv_std).reshape(c2, 1)
    shift = (params['bn_beta'].astype(jnp.float32).reshape(c2, 1)
             - mean.reshape(c2, 1) * scale)

    # ---- phase 2: conv -> BN -> gate -> 1x1 residual conv + skip -----------
    def main_map2(i):
        return (0, 0, i)

    def prev_map2(i):
        return (0, 0, jnp.maximum(i * nb - 1, 0))

    def next_map2(i):
        return (0, 0, jnp.minimum((i + 1) * nb, n_lane_blocks - 1))

    out = pl.pallas_call(
        functools.partial(_apply_kernel, dilation=d, l_tile=l_tile, n_tap=K,
                          n_tiles=n_tiles, left=left, channels=C),
        grid=(n_tiles,),
        in_specs=[pl.BlockSpec((B, C, _LANES), prev_map2),
                  pl.BlockSpec((B, C, l_tile), main_map2),
                  pl.BlockSpec((B, C, _LANES), next_map2),
                  _const_spec((c2, K * C), 1),
                  _const_spec((c2, 1), 1), _const_spec((c2, 1), 1),
                  _const_spec((C, C), 1), _const_spec((C, 1), 1)],
        out_specs=pl.BlockSpec((B, C, l_tile), main_map2),
        out_shape=jax.ShapeDtypeStruct((B, C, L), jnp.float32),
        compiler_params=pltpu.CompilerParams(
            dimension_semantics=("parallel",),
            vmem_limit_bytes=vmem_limit),
    )(x, x, x, w2, scale, shift, w_res, b_res)

    return out


def init_params(key, channels, kernel_size=5):
    """Deterministic synthetic parameters matching the PyTorch module shapes."""
    k1, k2, k3, k4, k5, k6 = jax.random.split(key, 6)
    c2 = 2 * channels
    return {
        'conv_w': 0.1 * jax.random.normal(k1, (c2, channels, kernel_size), jnp.float32),
        'conv_b': 0.1 * jax.random.normal(k2, (c2,), jnp.float32),
        'bn_gamma': 1.0 + 0.05 * jax.random.normal(k3, (c2,), jnp.float32),
        'bn_beta': 0.05 * jax.random.normal(k4, (c2,), jnp.float32),
        'res_w': 0.1 * jax.random.normal(k5, (channels, channels, 1), jnp.float32),
        'res_b': 0.1 * jax.random.normal(k6, (channels,), jnp.float32),
    }


def wavenet_block_reference(x, params, dilation, eps=1e-5):
    """Pure-JAX reference mirroring the PyTorch module (training-mode BN)."""
    B, C, L = x.shape
    d = int(dilation)
    out = jax.lax.conv_general_dilated(
        x, params['conv_w'], window_strides=(1,),
        padding=[(2 * d, 2 * d)], rhs_dilation=(d,),
        dimension_numbers=('NCH', 'OIH', 'NCH'))
    out = out + params['conv_b'][None, :, None]   # kept here; BN cancels it
    mean = jnp.mean(out, axis=(0, 2), keepdims=True)
    var = jnp.var(out, axis=(0, 2), keepdims=True)
    out = (out - mean) * jax.lax.rsqrt(var + eps)
    out = out * params['bn_gamma'][None, :, None] + params['bn_beta'][None, :, None]
    filt, gate = out[:, :C, :], out[:, C:, :]
    act = jnp.tanh(filt) * jax.nn.sigmoid(gate)
    res = jax.lax.conv_general_dilated(
        act, params['res_w'], window_strides=(1,), padding=[(0, 0)],
        dimension_numbers=('NCH', 'OIH', 'NCH'))
    return res + params['res_b'][None, :, None] + x


if __name__ == "__main__":
    key = jax.random.PRNGKey(0)
    kx, kp = jax.random.split(key)

    B, C, L = 2, 8, 512
    dilation = 2

    x = jax.random.normal(kx, (B, C, L), jnp.float32)     # NCL, like PyTorch
    params = init_params(kp, C)
    y_ref = wavenet_block_reference(x, params, dilation)

    # Default path: auto tile size (one 512-wide tile here), bf16 matmuls.
    y = wavenet_block(x, params, dilation)
    jax.block_until_ready(y)
    assert y.shape == (B, C, L)
    err = float(jnp.max(jnp.abs(y - y_ref)))
    assert err < 3e-2, f"auto-tile (bf16) mismatch vs reference: {err}"

    # Multi-tile path (4 tiles): exercises halo masking, the 2-way parallel
    # phase-1 stats split, and the accumulating BN reduction.
    y_t = wavenet_block(x, params, dilation, l_tile=128)
    jax.block_until_ready(y_t)
    err_t = float(jnp.max(jnp.abs(y_t - y_ref)))
    assert err_t < 3e-2, f"tiled (bf16) mismatch vs reference: {err_t}"

    # f32-matmul path: tight numerical check of the kernel structure.
    y_f = wavenet_block(x, params, dilation, l_tile=128,
                        matmul_dtype=jnp.float32)
    jax.block_until_ready(y_f)
    err_f = float(jnp.max(jnp.abs(y_f - y_ref)))
    assert err_f < 1e-3, f"tiled (f32) mismatch vs reference: {err_f}"

    print("KERNEL_OK")
</pallas_src>

<mosaic_0001>
module attributes {stable_mosaic.version = 11 : i64} {
  func.func @_stats_kernel(%arg0: i32, %arg1: i32, %arg2: memref<2x8x128xf32, #tpu.memory_space<vmem>>, %arg3: memref<2x8x512xf32, #tpu.memory_space<vmem>>, %arg4: memref<2x8x128xf32, #tpu.memory_space<vmem>>, %arg5: memref<16x40xbf16, #tpu.memory_space<vmem>>, %arg6: memref<1x2x16x128xf32, #tpu.memory_space<vmem>>) attributes {dimension_semantics = [#tpu.dimension_semantics<parallel>, #tpu.dimension_semantics<arbitrary>], iteration_bounds = array<i64: 1, 1>, scalar_prefetch = 0 : i64, scratch_operands = 0 : i64, tpu.core_type = #tpu.core_type<tc>, window_params = [{transform_indices = @transform_0, window_bounds = array<i64: 2, 8, 128>}, {transform_indices = @transform_1, window_bounds = array<i64: 2, 8, 512>}, {transform_indices = @transform_2, window_bounds = array<i64: 2, 8, 128>}, {pipeline_mode = #tpu.pipeline_mode<synchronous>, transform_indices = @transform_3, window_bounds = array<i64: 16, 40>}, {transform_indices = @transform_4, window_bounds = array<i64: 1, 2, 16, 128>}]} {
    %c1_i32 = arith.constant 1 : i32
    %0 = arith.muli %arg0, %c1_i32 : i32
    %1 = arith.addi %0, %arg1 : i32
    %c0_i32 = arith.constant 0 : i32
    %2 = arith.cmpi eq, %arg1, %c0_i32 : i32
    %3 = arith.extui %2 : i1 to i32
    %c0_i32_0 = arith.constant 0 : i32
    %4 = arith.cmpi ne, %3, %c0_i32_0 : i32
    scf.if %4 {
      %cst_29 = arith.constant 0.000000e+00 : f32
      %95 = vector.broadcast %cst_29 : f32 to vector<1x2x16x128xf32>
      %c0_30 = arith.constant 0 : index
      %c0_31 = arith.constant 0 : index
      %c0_32 = arith.constant 0 : index
      %c0_33 = arith.constant 0 : index
      %96 = vector.load %arg6[%c0_30, %c0_31, %c0_32, %c0_33] : memref<1x2x16x128xf32, #tpu.memory_space<vmem>>, vector<1x2x16x128xf32>
      tpu.vector_store %arg6[%c0_30, %c0_31, %c0_32, %c0_33], %95 {strides = array<i32>} : memref<1x2x16x128xf32, #tpu.memory_space<vmem>>, vector<1x2x16x128xf32>,
    } else {
    }
    %c0 = arith.constant 0 : index
    %c0_1 = arith.constant 0 : index
    %c0_2 = arith.constant 0 : index
    %5 = vector.load %arg3[%c0, %c0_1, %c0_2] : memref<2x8x512xf32, #tpu.memory_space<vmem>>, vector<2x8x512xf32>
    %c0_i32_3 = arith.constant 0 : i32
    %6 = arith.cmpi sgt, %1, %c0_i32_3 : i32
    %7 = arith.extui %6 : i1 to i32
    %8 = arith.sitofp %7 : i32 to f32
    %9 = arith.truncf %8 : f32 to bf16
    %c0_i32_4 = arith.constant 0 : i32
    %10 = arith.cmpi slt, %1, %c0_i32_4 : i32
    %11 = arith.extui %10 : i1 to i32
    %12 = arith.sitofp %11 : i32 to f32
    %13 = arith.truncf %12 : f32 to bf16
    %c0_5 = arith.constant 0 : index
    %c0_6 = arith.constant 0 : index
    %c124 = arith.constant 124 : index
    %14 = vector.load %arg2[%c0_5, %c0_6, %c124] : memref<2x8x128xf32, #tpu.memory_space<vmem>>, vector<2x8x4xf32>
    %15 = arith.truncf %14 : vector<2x8x4xf32> to vector<2x8x4xbf16>
    %16 = vector.broadcast %9 : bf16 to vector<2x8x4xbf16>
    %17 = arith.mulf %15, %16 : vector<2x8x4xbf16>
    %c0_7 = arith.constant 0 : index
    %c0_8 = arith.constant 0 : index
    %c0_9 = arith.constant 0 : index
    %18 = vector.load %arg4[%c0_7, %c0_8, %c0_9] : memref<2x8x128xf32, #tpu.memory_space<vmem>>, vector<2x8x4xf32>
    %19 = arith.truncf %18 : vector<2x8x4xf32> to vector<2x8x4xbf16>
    %20 = vector.broadcast %13 : bf16 to vector<2x8x4xbf16>
    %21 = arith.mulf %19, %20 : vector<2x8x4xbf16>
    %22 = arith.truncf %5 : vector<2x8x512xf32> to vector<2x8x512xbf16>
    %23 = tpu.concatenate %17, %22, %21 in 2 : vector<2x8x4xbf16>, vector<2x8x512xbf16>, vector<2x8x4xbf16> -> vector<2x8x520xbf16>
    %c0_10 = arith.constant 0 : index
    %c0_11 = arith.constant 0 : index
    %24 = vector.load %arg5[%c0_10, %c0_11] : memref<16x40xbf16, #tpu.memory_space<vmem>>, vector<16x40xbf16>
    %25 = vector.extract_strided_slice %23 {offsets = [0, 0, 0], sizes = [1, 8, 512], strides = [1, 1, 1]} : vector<2x8x520xbf16> to vector<1x8x512xbf16>
    %26 = vector.shape_cast %25 : vector<1x8x512xbf16> to vector<8x512xbf16>
    %27 = vector.extract_strided_slice %23 {offsets = [0, 0, 2], sizes = [1, 8, 512], strides = [1, 1, 1]} : vector<2x8x520xbf16> to vector<1x8x512xbf16>
    %28 = vector.shape_cast %27 : vector<1x8x512xbf16> to vector<8x512xbf16>
    %29 = vector.extract_strided_slice %23 {offsets = [0, 0, 4], sizes = [1, 8, 512], strides = [1, 1, 1]} : vector<2x8x520xbf16> to vector<1x8x512xbf16>
    %30 = vector.shape_cast %29 : vector<1x8x512xbf16> to vector<8x512xbf16>
    %31 = vector.extract_strided_slice %23 {offsets = [0, 0, 6], sizes = [1, 8, 512], strides = [1, 1, 1]} : vector<2x8x520xbf16> to vector<1x8x512xbf16>
    %32 = vector.shape_cast %31 : vector<1x8x512xbf16> to vector<8x512xbf16>
    %33 = vector.extract_strided_slice %23 {offsets = [0, 0, 8], sizes = [1, 8, 512], strides = [1, 1, 1]} : vector<2x8x520xbf16> to vector<1x8x512xbf16>
    %34 = vector.shape_cast %33 : vector<1x8x512xbf16> to vector<8x512xbf16>
    %35 = tpu.concatenate %26, %28, %30, %32, %34 in 0 : vector<8x512xbf16>, vector<8x512xbf16>, vector<8x512xbf16>, vector<8x512xbf16>, vector<8x512xbf16> -> vector<40x512xbf16>
    %36 = vector.extract_strided_slice %23 {offsets = [1, 0, 0], sizes = [1, 8, 512], strides = [1, 1, 1]} : vector<2x8x520xbf16> to vector<1x8x512xbf16>
    %37 = vector.shape_cast %36 : vector<1x8x512xbf16> to vector<8x512xbf16>
    %38 = vector.extract_strided_slice %23 {offsets = [1, 0, 2], sizes = [1, 8, 512], strides = [1, 1, 1]} : vector<2x8x520xbf16> to vector<1x8x512xbf16>
    %39 = vector.shape_cast %38 : vector<1x8x512xbf16> to vector<8x512xbf16>
    %40 = vector.extract_strided_slice %23 {offsets = [1, 0, 4], sizes = [1, 8, 512], strides = [1, 1, 1]} : vector<2x8x520xbf16> to vector<1x8x512xbf16>
    %41 = vector.shape_cast %40 : vector<1x8x512xbf16> to vector<8x512xbf16>
    %42 = vector.extract_strided_slice %23 {offsets = [1, 0, 6], sizes = [1, 8, 512], strides = [1, 1, 1]} : vector<2x8x520xbf16> to vector<1x8x512xbf16>
    %43 = vector.shape_cast %42 : vector<1x8x512xbf16> to vector<8x512xbf16>
    %44 = vector.extract_strided_slice %23 {offsets = [1, 0, 8], sizes = [1, 8, 512], strides = [1, 1, 1]} : vector<2x8x520xbf16> to vector<1x8x512xbf16>
    %45 = vector.shape_cast %44 : vector<1x8x512xbf16> to vector<8x512xbf16>
    %46 = tpu.concatenate %37, %39, %41, %43, %45 in 0 : vector<8x512xbf16>, vector<8x512xbf16>, vector<8x512xbf16>, vector<8x512xbf16>, vector<8x512xbf16> -> vector<40x512xbf16>
    %47 = tpu.concatenate %35, %46 in 1 : vector<40x512xbf16>, vector<40x512xbf16> -> vector<40x1024xbf16>
    %cst = arith.constant dense<0.000000e+00> : vector<16x1024xf32>
    %48 = tpu.matmul %24, %47, %cst {dimension_numbers = #tpu.dot_dimension_numbers<[1], [0], [0], [1], [0, 0, 1, 1], [], []>} : vector<16x40xbf16>, vector<40x1024xbf16>, vector<16x1024xf32> -> vector<16x1024xf32>
    %cst_12 = arith.constant 0.000000e+00 : f32
    %49 = vector.broadcast %cst_12 : f32 to vector<16x128xf32>
    %cst_13 = arith.constant 0.000000e+00 : f32
    %50 = vector.broadcast %cst_13 : f32 to vector<16x128xf32>
    %51 = vector.extract_strided_slice %48 {offsets = [0, 0], sizes = [16, 128], strides = [1, 1]} : vector<16x1024xf32> to vector<16x128xf32>
    %52 = arith.addf %49, %51 : vector<16x128xf32>
    %53 = arith.mulf %51, %51 : vector<16x128xf32>
    %54 = arith.addf %50, %53 : vector<16x128xf32>
    %55 = vector.extract_strided_slice %48 {offsets = [0, 128], sizes = [16, 128], strides = [1, 1]} : vector<16x1024xf32> to vector<16x128xf32>
    %56 = arith.addf %52, %55 : vector<16x128xf32>
    %57 = arith.mulf %55, %55 : vector<16x128xf32>
    %58 = arith.addf %54, %57 : vector<16x128xf32>
    %59 = vector.extract_strided_slice %48 {offsets = [0, 256], sizes = [16, 128], strides = [1, 1]} : vector<16x1024xf32> to vector<16x128xf32>
    %60 = arith.addf %56, %59 : vector<16x128xf32>
    %61 = arith.mulf %59, %59 : vector<16x128xf32>
    %62 = arith.addf %58, %61 : vector<16x128xf32>
    %63 = vector.extract_strided_slice %48 {offsets = [0, 384], sizes = [16, 128], strides = [1, 1]} : vector<16x1024xf32> to vector<16x128xf32>
    %64 = arith.addf %60, %63 : vector<16x128xf32>
    %65 = arith.mulf %63, %63 : vector<16x128xf32>
    %66 = arith.addf %62, %65 : vector<16x128xf32>
    %67 = vector.extract_strided_slice %48 {offsets = [0, 512], sizes = [16, 128], strides = [1, 1]} : vector<16x1024xf32> to vector<16x128xf32>
    %68 = arith.addf %64, %67 : vector<16x128xf32>
    %69 = arith.mulf %67, %67 : vector<16x128xf32>
    %70 = arith.addf %66, %69 : vector<16x128xf32>
    %71 = vector.extract_strided_slice %48 {offsets = [0, 640], sizes = [16, 128], strides = [1, 1]} : vector<16x1024xf32> to vector<16x128xf32>
    %72 = arith.addf %68, %71 : vector<16x128xf32>
    %73 = arith.mulf %71, %71 : vector<16x128xf32>
    %74 = arith.addf %70, %73 : vector<16x128xf32>
    %75 = vector.extract_strided_slice %48 {offsets = [0, 768], sizes = [16, 128], strides = [1, 1]} : vector<16x1024xf32> to vector<16x128xf32>
    %76 = arith.addf %72, %75 : vector<16x128xf32>
    %77 = arith.mulf %75, %75 : vector<16x128xf32>
    %78 = arith.addf %74, %77 : vector<16x128xf32>
    %79 = vector.extract_strided_slice %48 {offsets = [0, 896], sizes = [16, 128], strides = [1, 1]} : vector<16x1024xf32> to vector<16x128xf32>
    %80 = arith.addf %76, %79 : vector<16x128xf32>
    %81 = arith.mulf %79, %79 : vector<16x128xf32>
    %82 = arith.addf %78, %81 : vector<16x128xf32>
    %c0_14 = arith.constant 0 : index
    %c0_15 = arith.constant 0 : index
    %c0_16 = arith.constant 0 : index
    %c0_17 = arith.constant 0 : index
    %83 = vector.load %arg6[%c0_14, %c0_15, %c0_16, %c0_17] : memref<1x2x16x128xf32, #tpu.memory_space<vmem>>, vector<1x1x16x128xf32>
    %84 = vector.shape_cast %83 : vector<1x1x16x128xf32> to vector<16x128xf32>
    %85 = arith.addf %84, %80 : vector<16x128xf32>
    %c0_18 = arith.constant 0 : index
    %c0_19 = arith.constant 0 : index
    %c0_20 = arith.constant 0 : index
    %c0_21 = arith.constant 0 : index
    %86 = vector.load %arg6[%c0_18, %c0_19, %c0_20, %c0_21] : memref<1x2x16x128xf32, #tpu.memory_space<vmem>>, vector<1x1x16x128xf32>
    %87 = vector.shape_cast %86 : vector<1x1x16x128xf32> to vector<16x128xf32>
    %88 = vector.shape_cast %85 : vector<16x128xf32> to vector<1x1x16x128xf32>
    tpu.vector_store %arg6[%c0_18, %c0_19, %c0_20, %c0_21], %88 {strides = array<i32>} : memref<1x2x16x128xf32, #tpu.memory_space<vmem>>, vector<1x1x16x128xf32>,
    %c0_22 = arith.constant 0 : index
    %c1 = arith.constant 1 : index
    %c0_23 = arith.constant 0 : index
    %c0_24 = arith.constant 0 : index
    %89 = vector.load %arg6[%c0_22, %c1, %c0_23, %c0_24] : memref<1x2x16x128xf32, #tpu.memory_space<vmem>>, vector<1x1x16x128xf32>
    %90 = vector.shape_cast %89 : vector<1x1x16x128xf32> to vector<16x128xf32>
    %91 = arith.addf %90, %82 : vector<16x128xf32>
    %c0_25 = arith.constant 0 : index
    %c1_26 = arith.constant 1 : index
    %c0_27 = arith.constant 0 : index
    %c0_28 = arith.constant 0 : index
    %92 = vector.load %arg6[%c0_25, %c1_26, %c0_27, %c0_28] : memref<1x2x16x128xf32, #tpu.memory_space<vmem>>, vector<1x1x16x128xf32>
    %93 = vector.shape_cast %92 : vector<1x1x16x128xf32> to vector<16x128xf32>
    %94 = vector.shape_cast %91 : vector<16x128xf32> to vector<1x1x16x128xf32>
    tpu.vector_store %arg6[%c0_25, %c1_26, %c0_27, %c0_28], %94 {strides = array<i32>} : memref<1x2x16x128xf32, #tpu.memory_space<vmem>>, vector<1x1x16x128xf32>,
    return
  }
  func.func @transform_0(%arg0: i32, %arg1: i32) -> (i32, i32, i32) {
    %c1_i32 = arith.constant 1 : i32
    %0 = arith.muli %arg0, %c1_i32 : i32
    %1 = arith.addi %0, %arg1 : i32
    %c4_i32 = arith.constant 4 : i32
    %2 = arith.muli %1, %c4_i32 : i32
    %c1_i32_0 = arith.constant 1 : i32
    %3 = arith.subi %2, %c1_i32_0 : i32
    %c0_i32 = arith.constant 0 : i32
    %4 = arith.maxsi %3, %c0_i32 : i32
    %c0_i32_1 = arith.constant 0 : i32
    %c0_i32_2 = arith.constant 0 : i32
    %c0_i32_3 = arith.constant 0 : i32
    return %c0_i32_1, %c0_i32_2, %4 : i32, i32, i32
  }
  func.func @transform_1(%arg0: i32, %arg1: i32) -> (i32, i32, i32) {
    %c1_i32 = arith.constant 1 : i32
    %0 = arith.muli %arg0, %c1_i32 : i32
    %1 = arith.addi %0, %arg1 : i32
    %c0_i32 = arith.constant 0 : i32
    %c0_i32_0 = arith.constant 0 : i32
    %c0_i32_1 = arith.constant 0 : i32
    return %c0_i32, %c0_i32_0, %1 : i32, i32, i32
  }
  func.func @transform_2(%arg0: i32, %arg1: i32) -> (i32, i32, i32) {
    %c1_i32 = arith.constant 1 : i32
    %0 = arith.muli %arg0, %c1_i32 : i32
    %1 = arith.addi %0, %arg1 : i32
    %c1_i32_0 = arith.constant 1 : i32
    %2 = arith.addi %1, %c1_i32_0 : i32
    %c4_i32 = arith.constant 4 : i32
    %3 = arith.muli %2, %c4_i32 : i32
    %c3_i32 = arith.constant 3 : i32
    %4 = arith.minsi %3, %c3_i32 : i32
    %c0_i32 = arith.constant 0 : i32
    %c0_i32_1 = arith.constant 0 : i32
    %c0_i32_2 = arith.constant 0 : i32
    return %c0_i32, %c0_i32_1, %4 : i32, i32, i32
  }
  func.func @transform_3(%arg0: i32, %arg1: i32) -> (i32, i32) {
    %c0_i32 = arith.constant 0 : i32
    %c0_i32_0 = arith.constant 0 : i32
    %c0_i32_1 = arith.constant 0 : i32
    return %c0_i32, %c0_i32_0 : i32, i32
  }
  func.func @transform_4(%arg0: i32, %arg1: i32) -> (i32, i32, i32, i32) {
    %c0_i32 = arith.constant 0 : i32
    %c0_i32_0 = arith.constant 0 : i32
    %c0_i32_1 = arith.constant 0 : i32
    %c0_i32_2 = arith.constant 0 : i32
    return %arg0, %c0_i32, %c0_i32_0, %c0_i32_1 : i32, i32, i32, i32
  }
}

</mosaic_0001>

<bundles_post_ra>
// kernel: tpu_custom_call.1
= control target key start
LH: loop header
LB: loop body
LE: loop exit
PB: predicated region body
PF: predicated region fallthrough
CT: control target
= control target key end

     0   :  { %9 = vsyncpa [#allocation3], 0  ;;  %s1126_s0 = inlined_call_operand.hbm [shape: f32[2,8,512], index: 0, kind: input, shape index: {}]   ;;  %s1127_s1 = inlined_call_operand.hbm [shape: f32[2,8,512], index: 1, kind: input, shape index: {}]   ;;  %s1128_s2 = inlined_call_operand.hbm [shape: f32[2,8,512], index: 2, kind: input, shape index: {}]   ;;  %s1129_s3 = inlined_call_operand.hbm [shape: bf16[16,40], index: 3, kind: input, shape index: {}]   ;;  %s1130_s4 = inlined_call_operand.hbm [shape: f32[1,2,16,128], index: 4, kind: output, shape index: {}]  }
   0x1   :  { %10 = vsyncpa [#allocation6], 0 }
   0x2   :  { %11 = vsyncpa [#allocation9], 0  ;;  %s41_s17 = sshll.u32 %s1127_s1, 4  ;;  %s42_s17 = int_to_ptr.hbm [resolvable:$true] %s41_s17 }
   0x3   :  { %12 = vsyncpa [#allocation4], 0  ;;  %s848_s18 = smov [#allocation5]   ;;  %s24_s22 = sshll.u32 %s1126_s0, 4  ;;  %s25_s22 = int_to_ptr.hbm [resolvable:$true] %s24_s22 }
   0x4   :  { %s43_s19 = sshll.u32 %s848_s18, 4  ;;  %s849_s23 = smov 512   ;;  %s44_s19 = int_to_ptr.vmem [resolvable:$true] %s43_s19 }
   0x5   :  { %s850_s24 = smov 32   ;;  %s851_s25 = smov [#allocation2]  }
   0x6   :  { %49 = dma.hbm_to_vmem [thread:$0]  %s42_s17, 1024, %s44_s19, [#allocation6], %s849_s23, %s849_s23, %s850_s24  }
   0x7   :  { %s26_s26 = sshll.u32 %s851_s25, 4  ;;  %s852_s27 = smov 128   ;;  %s27_s26 = int_to_ptr.vmem [resolvable:$true] %s26_s26 }
   0x8   :  { %s853_s28 = smov 8   ;;  %s60_s30 = scalar_lea.hbm %s1128_s2, 24 }
   0x9   :  { %32 = dma.hbm_to_vmem [thread:$0]  %s25_s22, 256, %s27_s26, [#allocation3], %s849_s23, %s852_s27, %s853_s28  }
   0xa   :  { %s61_s5 = sshll.u32 %s60_s30, 4  ;;  %s854_s6 = smov [#allocation7]   ;;  %s62_s5 = int_to_ptr.hbm [resolvable:$true] %s61_s5 }
   0xb   :  { %s63_s7 = sshll.u32 %s854_s6, 4  ;;  %s74_s9 = sshll.u32 %s1129_s3, 4  ;;  %s64_s7 = int_to_ptr.vmem [resolvable:$true] %s63_s7  ;;  %s75_s9 = int_to_ptr.hbm [resolvable:$true] %s74_s9 }
   0xc   :  { %69 = dma.hbm_to_vmem [thread:$0]  %s62_s5, 256, %s64_s7, [#allocation6], %s849_s23, %s852_s27, %s853_s28  }
   0xd   :  { %s855_s10 = smov [#allocation8]   ;;  %s856_s12 = smov 64  }
   0xe   :  { %s76_s11 = sshll.u32 %s855_s10, 4  ;;  %s857_s13 = smov 4   ;;  %s77_s11 = int_to_ptr.vmem [resolvable:$true] %s76_s11 }
   0xf   :  { %82 = dma.hbm_to_vmem [thread:$0]  %s75_s9, 128, %s77_s11, [#allocation9], %s856_s12, %s856_s12, %s857_s13  }
  0x10   :  { %840 = dma.done.wait [#allocation3], 256  }
  0x11   :  { %841 = vsyncadd [#allocation3], 4294967040 }
  0x12   :  { %842 = dma.done.wait [#allocation6], 1280  }
  0x13   :  { %843 = vsyncadd [#allocation6], 4294966016 }
  0x14   :  { %844 = dma.done.wait [#allocation9], 128  }
  0x15   :  { %845 = vsyncadd [#allocation9], 4294967168  ;;  %v123_v0 = vld [vmem:[#allocation5 + $0x10] sm:$0xff]  ;;  %v124_v1 = vld [vmem:[#allocation5 + $0x18] sm:$0xff]  ;;  %v858_v12 = vmov 0.0   ;;  %vm235_vm0 = vcmask 31744  }
  0x16   :  { %v121_v2 = vld [vmem:[#allocation5] sm:$0xff]  ;;  %v186_v3 = vpack.c.bf16 %v124_v1, %v123_v0  ;;  %v122_v4 = vld [vmem:[#allocation5 + $0x8] sm:$0xff]  ;;  %v127_v5 = vld [vmem:[#allocation5 + $0x30] sm:$0xff]  ;;  %v165_v13 = vunpack.c.l.bf16 %v858_v12  ;;  %s859_s2 = smov 120   ;;  %s860_s3 = smov 124   ;;  %vm329_vm1 = vcmask 982016  }
  0x17   :  { %v128_v6 = vld [vmem:[#allocation5 + $0x38] sm:$0xff]  ;;  %v185_v7 = vpack.c.bf16 %v122_v4, %v121_v2  ;;  %v155_v8 = vld [vmem:[#allocation2] sm:$0xff]  ;;  %v170_v19 = vld [vmem:[#allocation7] sm:$0xff]  ;;  %s861_s14 = smov 122   ;;  %s862_s15 = smov 126   ;;  %vm334_vm2 = vcmask 1043456  }
  0x18   :  { %v206_v9 = vunpack.c.h.b16 %v186_v3  ;;  %v188_v10 = vpack.c.bf16 %v128_v6, %v127_v5  ;;  %v157_v11 = vpack.c.bf16 %v155_v8, %v155_v8  ;;  %v156_v18 = vld [vmem:[#allocation2 + $0x8] sm:$0xff]  ;;  %v171_v20 = vld [vmem:[#allocation7 + $0x8] sm:$0xff]  ;;  %v205_v24 = vunpack.c.l.b16 %v186_v3  ;;  %v125_v26 = vld [vmem:[#allocation5 + $0x20] sm:$0xff]  ;;  %s863_s16 = smov [#allocation10]   ;;  %s672_s20 = sshll.u32 %s1130_s4, 4  ;;  %s673_s20 = int_to_ptr.hbm [resolvable:$true] %s672_s20 }
  0x19   :  { %v204_v14 = vunpack.c.h.b16 %v185_v7  ;;  %v203_v15 = vunpack.c.l.b16 %v185_v7  ;;  %v126_v27 = vld [vmem:[#allocation5 + $0x28] sm:$0xff]  ;;  %v158_v29 = vpack.c.bf16 %v156_v18, %v156_v18  ;;  %v172_v30 = vpack.c.bf16 %v170_v19, %v170_v19  ;;  %s670_s17 = sshll.u32 %s863_s16, 4  ;;  %s671_s17 = int_to_ptr.vmem [resolvable:$true] %s670_s17 }
  0x1a   :  { %v214_v16 = vpack.c.b16 %v206_v9, %v206_v9  ;;  %v163_v17 = vunpack.c.l.bf16 %v157_v11  ;;  %v209_v23 = vunpack.c.l.b16 %v188_v10  ;;  %v210_v28 = vunpack.c.h.b16 %v188_v10 }
  0x1b   :  { %v212_v21 = vpack.c.b16 %v204_v14, %v204_v14  ;;  %v211_v22 = vpack.c.b16 %v203_v15, %v203_v15  ;;  %v173_v31 = vpack.c.bf16 %v171_v20, %v171_v20  ;;  %v178_v32 = vunpack.c.l.bf16 %v172_v30 }
  0x1c   :  { %225 = vrot.lane.b32.xlu1 %v214_v16, %s857_s13  ;;  %v166_v25 = vmul.f32 %v165_v13, %v163_v17  ;;  %v217_v33 = vpack.c.b16 %v209_v23, %v209_v23  ;;  %v213_v34 = vpack.c.b16 %v205_v24, %v205_v24  ;;  %v187_v36 = vpack.c.bf16 %v126_v27, %v125_v26 }
  0x1d   :  { %221 = vrot.lane.b32.xlu0 %v212_v21, %s857_s13  ;;  %219 = vrot.lane.b32.xlu2 %v211_v22, %s857_s13  ;;  %v218_v37 = vpack.c.b16 %v210_v28, %v210_v28  ;;  %v164_v38 = vunpack.c.l.bf16 %v158_v29  ;;  %v181_v39 = vmul.f32 %v178_v32, %v165_v13  ;;  %v179_v40 = vunpack.c.l.bf16 %v173_v31 }
  0x1e   :  { %v168_v35 = vpack.c.bf16 %v166_v25, %v166_v25  ;;  %v208_v43 = vunpack.c.h.b16 %v187_v36  ;;  %v207_v52 = vunpack.c.l.b16 %v187_v36  ;;  %vm314_vm3 = vcmask 998400  }
  0x1f   :  { %v183_v41 = vpack.c.bf16 %v181_v39, %v181_v39  ;;  %v167_v44 = vmul.f32 %v165_v13, %v164_v38  ;;  %v182_v46 = vmul.f32 %v179_v40, %v165_v13  ;;  %vm299_vm4 = vcmask 1014784  }
  0x20   :  { %v191_v42 = vunpack.c.l.b16 %v168_v35  ;;  %v216_v48 = vpack.c.b16 %v208_v43, %v208_v43  ;;  %v215_v55 = vpack.c.b16 %v207_v52, %v207_v52  ;;  %vm284_vm5 = vcmask 1031168  }
  0x21   :  { %v244_v45 = vunpack.c.l.b16 %v183_v41  ;;  %v169_v49 = vpack.c.bf16 %v167_v44, %v167_v44  ;;  %v184_v51 = vpack.c.bf16 %v182_v46, %v182_v46  ;;  %vm465_vm6 = vcmask 326656  }
  0x22   :  { %v193_v47 = vpack.c.b16 %v191_v42, %v191_v42 }
  0x23   :  { %v246_v50 = vpack.c.b16 %v244_v45, %v244_v45  ;;  %v192_v53 = vunpack.c.l.b16 %v169_v49  ;;  %v245_v54 = vunpack.c.l.b16 %v184_v51 }
  0x24   :  { %231 = vrot.lane.b32.xlu1 %v217_v33, %s857_s13 }
  0x25   :  { %223 = vrot.lane.b32.xlu0 %v213_v34, %s857_s13  ;;  %233 = vrot.lane.b32.xlu2 %v218_v37, %s857_s13  ;;  %v194_v56 = vpack.c.b16 %v192_v53, %v192_v53  ;;  %v247_v57 = vpack.c.b16 %v245_v54, %v245_v54 }
  0x2c   :  { %195 = vrot.lane.b32.xlu1 %v193_v47, %s857_s13 }
  0x2d   :  { %229 = vrot.lane.b32.xlu0 %v216_v48, %s857_s13  ;;  %248 = vrot.lane.b32.xlu2 %v246_v50, %s857_s13 }
  0x34   :  { %227 = vrot.lane.b32.xlu1 %v215_v55, %s857_s13 }
  0x35   :  { %197 = vrot.lane.b32.xlu0 %v194_v56, %s857_s13  ;;  %250 = vrot.lane.b32.xlu2 %v247_v57, %s857_s13 }
  0x77   :  { %v220_v0 = vpop.permute.xlu2 %219 }
  0x7f   :  { %v234_v7 = vpop.permute.xlu2 %233 }
  0x87   :  { %v249_v13 = vpop.permute.xlu2 %248 }
  0x8e   :  { %v226_v58 = vpop.permute.xlu1 %225 }
  0x8f   :  { %v222_v59 = vpop.permute.xlu0 %221  ;;  %v261_v15 = vsel %vm235_vm0, %v226_v58, %v249_v13  ;;  %v251_v19 = vpop.permute.xlu2 %250 }
  0x90   :  { %v931_v3 = vsel %vm235_vm0, %v220_v0, %v222_v59  ;;  %v273_v20 = vrot.slane %v261_v15, 4  ;;  %v264_v21 = vsel %vm235_vm0, %v234_v7, %v251_v19 }
  0x91   :  { %v270_v10 = vrot.slane %v931_v3, 4  ;;  %v372_v24 = vrot.slane %v264_v21, 4 }
  0x96   :  { %v232_v60 = vpop.permute.xlu1 %231 }
  0x97   :  { %v224_v61 = vpop.permute.xlu0 %223  ;;  %v953_v9 = vsel %vm235_vm0, %v232_v60, %v234_v7 }
  0x98   :  { %v919_v62 = vsel %vm235_vm0, %v222_v59, %v224_v61  ;;  %v922_v63 = vsel %vm235_vm0, %v224_v61, %v226_v58  ;;  %v371_v14 = vrot.slane %v953_v9, 4 }
  0x99   :  { %325 = vrot.lane.b32.xlu1 %v922_v63, %s859_s2  ;;  %323 = vrot.lane.b32.xlu0 %v919_v62, %s859_s2  ;;  %v271_v8 = vrot.slane %v919_v62, 4  ;;  %v272_v11 = vrot.slane %v922_v63, 4 }
  0x9a   :  { %293 = vrot.lane.b32.xlu2 %v919_v62, %s860_s3 }
  0x9e   :  { %v196_v1 = vpop.permute.xlu1 %195 }
  0x9f   :  { %v230_v2 = vpop.permute.xlu0 %229  ;;  %v967_v12 = vsel %vm235_vm0, %v196_v1, %v220_v0 }
  0xa0   :  { %v934_v4 = vsel %vm235_vm0, %v230_v2, %v232_v60  ;;  %v269_v22 = vrot.slane %v967_v12, 4 }
  0xa1   :  { %291 = vrot.lane.b32.xlu1 %v931_v3, %s860_s3  ;;  %321 = vrot.lane.b32.xlu0 %v931_v3, %s859_s2  ;;  %v370_v17 = vrot.slane %v934_v4, 4 }
  0xa2   :  { %419 = vrot.lane.b32.xlu2 %v934_v4, %s859_s2 }
  0xa6   :  { %v228_v5 = vpop.permute.xlu1 %227 }
  0xa7   :  { %v943_v6 = vsel %vm235_vm0, %v228_v5, %v230_v2  ;;  %v198_v16 = vpop.permute.xlu0 %197 }
  0xa8   :  { %v980_v18 = vsel %vm235_vm0, %v198_v16, %v228_v5  ;;  %v369_v23 = vrot.slane %v943_v6, 4 }
  0xa9   :  { %391 = vrot.lane.b32.xlu1 %v934_v4, %s860_s3  ;;  %295 = vrot.lane.b32.xlu0 %v922_v63, %s860_s3  ;;  %v368_v25 = vrot.slane %v980_v18, 4 }
  0xaa   :  { %417 = vrot.lane.b32.xlu2 %v943_v6, %s859_s2 }
  0xb1   :  { %308 = vrot.lane.b32.xlu1 %v271_v8, %s861_s14  ;;  %421 = vrot.lane.b32.xlu0 %v953_v9, %s859_s2 }
  0xb2   :  { %393 = vrot.lane.b32.xlu2 %v953_v9, %s860_s3 }
  0xb9   :  { %306 = vrot.lane.b32.xlu1 %v270_v10, %s861_s14  ;;  %389 = vrot.lane.b32.xlu0 %v943_v6, %s860_s3 }
  0xba   :  { %310 = vrot.lane.b32.xlu2 %v272_v11, %s861_s14 }
  0xc1   :  { %280 = vrot.lane.b32.xlu1 %v272_v11, %s862_s15  ;;  %278 = vrot.lane.b32.xlu0 %v271_v8, %s862_s15 }
  0xc2   :  { %319 = vrot.lane.b32.xlu2 %v967_v12, %s859_s2 }
  0xc9   :  { %276 = vrot.lane.b32.xlu0 %v270_v10, %s862_s15  ;;  %407 = vrot.lane.b32.xlu1 %v371_v14, %s861_s14 }
  0xca   :  { %297 = vrot.lane.b32.xlu2 %v261_v15, %s860_s3 }
  0xd1   :  { %405 = vrot.lane.b32.xlu0 %v370_v17, %s861_s14  ;;  %327 = vrot.lane.b32.xlu1 %v261_v15, %s859_s2 }
  0xd2   :  { %387 = vrot.lane.b32.xlu2 %v980_v18, %s860_s3 }
  0xd9   :  { %289 = vrot.lane.b32.xlu0 %v967_v12, %s860_s3  ;;  %415 = vrot.lane.b32.xlu1 %v980_v18, %s859_s2 }
  0xda   :  { %377 = vrot.lane.b32.xlu2 %v370_v17, %s862_s15 }
  0xe1   :  { %395 = vrot.lane.b32.xlu1 %v264_v21, %s860_s3  ;;  %423 = vrot.lane.b32.xlu0 %v264_v21, %s859_s2 }
  0xe2   :  { %312 = vrot.lane.b32.xlu2 %v273_v20, %s861_s14 }
  0xe9   :  { %282 = vrot.lane.b32.xlu1 %v273_v20, %s862_s15  ;;  %304 = vrot.lane.b32.xlu0 %v269_v22, %s861_s14 }
  0xea   :  { %274 = vrot.lane.b32.xlu2 %v269_v22, %s862_s15 }
  0xf1   :  { %403 = vrot.lane.b32.xlu0 %v369_v23, %s861_s14  ;;  %409 = vrot.lane.b32.xlu1 %v372_v24, %s861_s14 }
  0xf2   :  { %401 = vrot.lane.b32.xlu2 %v368_v25, %s861_s14 }
  0xf4   :  { %v294_v26 = vpop.permute.xlu2 %293 }
  0xf9   :  { %379 = vrot.lane.b32.xlu0 %v371_v14, %s862_s15  ;;  %373 = vrot.lane.b32.xlu1 %v368_v25, %s862_s15 }
  0xfa   :  { %375 = vrot.lane.b32.xlu2 %v369_v23, %s862_s15 }
  0xfc   :  { %v420_v27 = vpop.permute.xlu2 %419 }
 0x101   :  { %381 = vrot.lane.b32.xlu0 %v372_v24, %s862_s15 }
 0x104   :  { %v1008_v28 = vpop.permute.xlu2 %417 }
 0x105   :  { %v426_v7 = vsel %vm329_vm1, %v1008_v28, %v420_v27 }
 0x106   :  { %v485_v11 = vsel %vm334_vm2, %v426_v7, 0 }
 0x10b   :  { %v1010_v29 = vpop.permute.xlu1 %325  ;;  %v324_v30 = vpop.permute.xlu0 %323 }
 0x10c   :  { %v1012_v31 = vpop.permute.xlu2 %393  ;;  %v332_v32 = vsel %vm329_vm1, %v324_v30, %v1010_v29 }
 0x10d   :  { %v476_v33 = vsel %vm334_vm2, %v332_v32, 0 }
 0x10e   :  { %526 = vmatpush.bf16.msra.mxu2 %v476_v33 }
 0x113   :  { %v1017_v34 = vpop.permute.xlu1 %291  ;;  %v322_v35 = vpop.permute.xlu0 %321 }
 0x114   :  { %v311_v36 = vpop.permute.xlu2 %310  ;;  %v331_v37 = vsel %vm329_vm1, %v322_v35, %v324_v30  ;;  %v301_v52 = vsel %vm299_vm4, %v1017_v34, %v294_v26 }
 0x115   :  { %v473_v38 = vsel %vm334_vm2, %v331_v37, 0 }
 0x116   :  { %512 = vmatpush.bf16.msra.mxu1 %v473_v38 }
 0x11b   :  { %v392_v39 = vpop.permute.xlu1 %391  ;;  %v296_v40 = vpop.permute.xlu0 %295 }
 0x11c   :  { %v320_v41 = vpop.permute.xlu2 %319  ;;  %v302_v46 = vsel %vm299_vm4, %v294_v26, %v296_v40  ;;  %v399_v16 = vsel %vm299_vm4, %v392_v39, %v1012_v31 }
 0x11d   :  { %v330_v42 = vsel %vm329_vm1, %v320_v41, %v322_v35 }
 0x11e   :  { %v470_v43 = vsel %vm334_vm2, %v330_v42, 0 }
 0x11f   :  { %498 = vmatpush.bf16.msra.mxu0 %v470_v43 }
 0x123   :  { %v309_v44 = vpop.permute.xlu1 %308  ;;  %v422_v45 = vpop.permute.xlu0 %421 }
 0x124   :  { %v317_v47 = vsel %vm314_vm3, %v309_v44, %v311_v36  ;;  %v298_v48 = vpop.permute.xlu2 %297  ;;  %v427_v59 = vsel %vm329_vm1, %v420_v27, %v422_v45 }
 0x125   :  { %v360_v49 = vsel %vm334_vm2, %v302_v46, %v317_v47  ;;  %v488_v0 = vsel %vm334_vm2, %v427_v59, 0  ;;  %v303_v22 = vsel %vm299_vm4, %v296_v40, %v298_v48 }
 0x126   :  { %527 = vmatpush.bf16.msra.mxu2 %v360_v49 }
 0x12b   :  { %v307_v50 = vpop.permute.xlu1 %306  ;;  %v1026_v51 = vpop.permute.xlu0 %389 }
 0x12c   :  { %v316_v53 = vsel %vm314_vm3, %v307_v50, %v309_v44  ;;  %v1033_v54 = vsel %vm299_vm4, %v1026_v51, %v392_v39  ;;  %v1036_v56 = vpop.permute.xlu2 %387 }
 0x12d   :  { %v356_v55 = vsel %vm334_vm2, %v301_v52, %v316_v53  ;;  %v397_v47 = vsel %vm299_vm4, %v1036_v56, %v1026_v51 }
 0x12e   :  { %513 = vmatpush.bf16.msra.mxu1 %v356_v55 }
 0x133   :  { %v281_v57 = vpop.permute.xlu1 %280  ;;  %v279_v58 = vpop.permute.xlu0 %278 }
 0x134   :  { %v287_v60 = vsel %vm284_vm5, %v279_v58, %v281_v57  ;;  %v1043_v1 = vpop.permute.xlu2 %377 }
 0x135   :  { %v344_v61 = vsel %vm334_vm2, %v919_v62, %v287_v60  ;;  %v1051_v62 = vld [vmem:[#allocation8] sm:$0xff] }
 0x136   :  { %528 = vmatpush.bf16.msra.mxu2 %v344_v61 }
 0x139   :  { %697 = vmatmul.msk.bf16.vlgmr.msra.gmra.mxu2 %vm465_vm6, %v1051_v62 }
 0x13a   :  { %582 = vmatpush.bf16.msrb.mxu2 %v488_v0 }
 0x13b   :  { %v277_v2 = vpop.permute.xlu0 %276  ;;  %v408_v5 = vpop.permute.xlu1 %407 }
 0x13c   :  { %v286_v8 = vsel %vm284_vm5, %v277_v2, %v279_v58  ;;  %v313_v13 = vpop.permute.xlu2 %312 }
 0x13d   :  { %v340_v10 = vsel %vm334_vm2, %v931_v3, %v286_v8  ;;  %v318_v21 = vsel %vm314_vm3, %v311_v36, %v313_v13 }
 0x13e   :  { %514 = vmatpush.bf16.msra.mxu1 %v340_v10  ;;  %v364_v23 = vsel %vm334_vm2, %v303_v22, %v318_v21 }
 0x141   :  { %696 = vmatmul.msk.bf16.vlgmr.msra.gmra.mxu1 %vm465_vm6, %v1051_v62 }
 0x142   :  { %568 = vmatpush.bf16.msrb.mxu1 %v485_v11 }
 0x143   :  { %v406_v14 = vpop.permute.xlu0 %405  ;;  %v328_v15 = vpop.permute.xlu1 %327 }
 0x144   :  { %v413_v3 = vsel %vm314_vm3, %v406_v14, %v408_v5  ;;  %v333_v17 = vsel %vm329_vm1, %v1010_v29, %v328_v15  ;;  %v275_v26 = vpop.permute.xlu2 %274 }
 0x145   :  { %v479_v19 = vsel %vm334_vm2, %v333_v17, 0  ;;  %v454_v20 = vsel %vm334_vm2, %v399_v16, %v413_v3  ;;  %v285_v42 = vsel %vm284_vm5, %v275_v26, %v277_v2 }
 0x146   :  { %540 = vmatpush.bf16.msra.mxu3 %v479_v19  ;;  %583 = vmatpush.bf16.msrb.mxu2 %v454_v20 }
 0x14a   :  { %541 = vmatpush.bf16.msra.mxu3 %v364_v23 }
 0x14b   :  { %v290_v24 = vpop.permute.xlu0 %289  ;;  %v416_v25 = vpop.permute.xlu1 %415 }
 0x14c   :  { %v402_v32 = vpop.permute.xlu2 %401  ;;  %v300_v37 = vsel %vm299_vm4, %v290_v24, %v1017_v34  ;;  %v425_v43 = vsel %vm329_vm1, %v416_v25, %v1008_v28  ;;  %v336_v34 = vsel %vm334_vm2, %v967_v12, %v285_v42 }
 0x153   :  { %v396_v27 = vpop.permute.xlu1 %395  ;;  %v424_v30 = vpop.permute.xlu0 %423 }
 0x154   :  { %v400_v29 = vsel %vm299_vm4, %v1012_v31, %v396_v27  ;;  %v428_v36 = vsel %vm329_vm1, %v422_v45, %v424_v30  ;;  %v376_v44 = vpop.permute.xlu2 %375 }
 0x155   :  { %v491_v31 = vsel %vm334_vm2, %v428_v36, 0  ;;  %v384_v53 = vsel %vm284_vm5, %v376_v44, %v1043_v1 }
 0x156   :  { %v434_v51 = vsel %vm334_vm2, %v943_v6, %v384_v53 }
 0x15b   :  { %v283_v33 = vpop.permute.xlu1 %282  ;;  %v305_v35 = vpop.permute.xlu0 %304 }
 0x15c   :  { %v288_v38 = vsel %vm284_vm5, %v281_v57, %v283_v33  ;;  %v315_v39 = vsel %vm314_vm3, %v305_v35, %v307_v50 }
 0x15d   :  { %v352_v40 = vsel %vm334_vm2, %v300_v37, %v315_v39  ;;  %v348_v41 = vsel %vm334_vm2, %v922_v63, %v288_v38  ;;  %v482_v63 = vsel %vm334_vm2, %v425_v43, 0 }
 0x15e   :  { %499 = vmatpush.bf16.msra.mxu0 %v352_v40  ;;  %542 = vmatpush.bf16.msra.mxu3 %v348_v41 }
 0x161   :  { %698 = vmatmul.msk.bf16.vlgmr.msra.gmra.mxu3 %vm465_vm6, %v1051_v62 }
 0x162   :  { %596 = vmatpush.bf16.msrb.mxu3 %v491_v31  ;;  %500 = vmatpush.bf16.msra.mxu0 %v336_v34 }
 0x163   :  { %v404_v45 = vpop.permute.xlu0 %403  ;;  %v410_v46 = vpop.permute.xlu1 %409 }
 0x164   :  { %v411_v48 = vsel %vm314_vm3, %v402_v32, %v404_v45  ;;  %v412_v28 = vsel %vm314_vm3, %v404_v45, %v406_v14  ;;  %v414_v12 = vsel %vm314_vm3, %v408_v5, %v410_v46 }
 0x165   :  { %695 = vmatmul.msk.bf16.vlgmr.msra.gmra.mxu0 %vm465_vm6, %v1051_v62  ;;  %v450_v49 = vsel %vm334_vm2, %v1033_v54, %v412_v28  ;;  %v458_v50 = vsel %vm334_vm2, %v400_v29, %v414_v12  ;;  %v446_v52 = vsel %vm334_vm2, %v397_v47, %v411_v48 }
 0x166   :  { %554 = vmatpush.bf16.msrb.mxu0 %v482_v63  ;;  %569 = vmatpush.bf16.msrb.mxu1 %v450_v49 }
 0x167   :  { %597 = vmatpush.bf16.msrb.mxu3 %v458_v50 }
 0x16a   :  { %555 = vmatpush.bf16.msrb.mxu0 %v446_v52  ;;  %570 = vmatpush.bf16.msrb.mxu1 %v434_v51 }
 0x16b   :  { %v380_v55 = vpop.permute.xlu0 %379  ;;  %v374_v56 = vpop.permute.xlu1 %373 }
 0x16c   :  { %v385_v57 = vsel %vm284_vm5, %v1043_v1, %v380_v55  ;;  %v383_v54 = vsel %vm284_vm5, %v374_v56, %v376_v44 }
 0x16d   :  { %v430_v58 = vsel %vm334_vm2, %v980_v18, %v383_v54  ;;  %v438_v59 = vsel %vm334_vm2, %v934_v4, %v385_v57  ;;  %700 = vmatmul.msk.bf16.vlgmr.msrb.gmra.mxu1 %vm465_vm6, %v1051_v62 }
 0x16e   :  { %556 = vmatpush.bf16.msrb.mxu0 %v430_v58  ;;  %584 = vmatpush.bf16.msrb.mxu2 %v438_v59 }
 0x171   :  { %701 = vmatmul.msk.bf16.vlgmr.msrb.gmra.mxu2 %vm465_vm6, %v1051_v62 }
 0x173   :  { %v382_v6 = vpop.permute.xlu0 %381 }
 0x174   :  { %v386_v60 = vsel %vm284_vm5, %v380_v55, %v382_v6 }
 0x175   :  { %699 = vmatmul.msk.bf16.vlgmr.msrb.gmra.mxu0 %vm465_vm6, %v1051_v62  ;;  %v442_v18 = vsel %vm334_vm2, %v953_v9, %v386_v60 }
 0x176   :  { %598 = vmatpush.bf16.msrb.mxu3 %v442_v18 }
 0x179   :  { %702 = vmatmul.msk.bf16.vlgmr.msrb.gmra.mxu3 %vm465_vm6, %v1051_v62 }
 0x1bc   :  { %v530_v0 = vpop.f32.mrf.mxu2 }
 0x1bd   :  { %v619_v13 = vmul.f32 %v530_v0, %v530_v0 }
 0x1be   :  { %v516_v4 = vpop.f32.mrf.mxu1 }
 0x1bf   :  { %v613_v2 = vmul.f32 %v516_v4, %v516_v4 }
 0x1c4   :  { %v532_v15 = vpop.f32.mrf.mxu2 }
 0x1c5   :  { %v620_v30 = vmul.f32 %v532_v15, %v532_v15 }
 0x1c6   :  { %v518_v5 = vpop.f32.mrf.mxu1 }
 0x1c7   :  { %v614_v20 = vmul.f32 %v518_v5, %v518_v5 }
 0x1e2   :  { %v502_v61 = vpop.f32.mrf.mxu0 }
 0x1e3   :  { %v607_v1 = vmul.f32 %v502_v61, %v502_v61  ;;  %v611_v7 = vadd.f32 %v516_v4, %v502_v61 }
 0x1e4   :  { %v544_v8 = vpop.f32.mrf.mxu3 }
 0x1e5   :  { %v615_v11 = vadd.f32 %v613_v2, %v607_v1  ;;  %v617_v14 = vadd.f32 %v611_v7, %v530_v0  ;;  %v625_v9 = vmul.f32 %v544_v8, %v544_v8 }
 0x1e7   :  { %v621_v3 = vadd.f32 %v619_v13, %v615_v11  ;;  %v623_v17 = vadd.f32 %v617_v14, %v544_v8 }
 0x1e9   :  { %v627_v25 = vadd.f32 %v625_v9, %v621_v3 }
 0x1ea   :  { %v504_v10 = vpop.f32.mrf.mxu0  ;;  %v572_v21 = vpop.f32.mrf.mxu1 }
 0x1eb   :  { %v608_v16 = vmul.f32 %v504_v10, %v504_v10  ;;  %v612_v19 = vadd.f32 %v518_v5, %v504_v10  ;;  %v637_v32 = vmul.f32 %v572_v21, %v572_v21 }
 0x1ec   :  { %v546_v26 = vpop.f32.mrf.mxu3 }
 0x1ed   :  { %v616_v22 = vadd.f32 %v614_v20, %v608_v16  ;;  %v618_v27 = vadd.f32 %v612_v19, %v532_v15  ;;  %v626_v38 = vmul.f32 %v546_v26, %v546_v26 }
 0x1ef   :  { %v622_v35 = vadd.f32 %v620_v30, %v616_v22  ;;  %v624_v37 = vadd.f32 %v618_v27, %v546_v26 }
 0x1f1   :  { %v628_v42 = vadd.f32 %v626_v38, %v622_v35 }
 0x1f2   :  { %v558_v62 = vpop.f32.mrf.mxu0  ;;  %v574_v44 = vpop.f32.mrf.mxu1 }
 0x1f3   :  { %v629_v23 = vadd.f32 %v623_v17, %v558_v62  ;;  %v631_v24 = vmul.f32 %v558_v62, %v558_v62  ;;  %v638_v12 = vmul.f32 %v574_v44, %v574_v44 }
 0x1f4   :  { %v586_v33 = vpop.f32.mrf.mxu2 }
 0x1f5   :  { %v633_v29 = vadd.f32 %v631_v24, %v627_v25  ;;  %v635_v36 = vadd.f32 %v629_v23, %v572_v21  ;;  %v643_v40 = vmul.f32 %v586_v33, %v586_v33 }
 0x1f7   :  { %v639_v39 = vadd.f32 %v637_v32, %v633_v29  ;;  %v641_v31 = vadd.f32 %v635_v36, %v586_v33 }
 0x1f9   :  { %v645_v47 = vadd.f32 %v643_v40, %v639_v39 }
 0x1fa   :  { %v560_v41 = vpop.f32.mrf.mxu0 }
 0x1fb   :  { %v630_v43 = vadd.f32 %v624_v37, %v560_v41  ;;  %v632_v34 = vmul.f32 %v560_v41, %v560_v41 }
 0x1fc   :  { %v600_v63 = vpop.f32.mrf.mxu3  ;;  %v588_v49 = vpop.f32.mrf.mxu2 }
 0x1fd   :  { %v634_v45 = vadd.f32 %v632_v34, %v628_v42  ;;  %v647_v46 = vadd.f32 %v641_v31, %v600_v63  ;;  %v649_v48 = vmul.f32 %v600_v63, %v600_v63  ;;  %v636_v28 = vadd.f32 %v630_v43, %v574_v44 }
 0x1fe   :  { %v644_v51 = vmul.f32 %v588_v49, %v588_v49 }
 0x1ff   :  { %v651_v50 = vadd.f32 %v649_v48, %v645_v47  ;;  %v640_v52 = vadd.f32 %v638_v12, %v634_v45  ;;  %657 = vst [vmem:[#allocation10] sm:$0xff] %v647_v46  ;;  %v642_v53 = vadd.f32 %v636_v28, %v588_v49 }
 0x201   :  { %664 = vst [vmem:[#allocation10 + $0x10] sm:$0xff] %v651_v50  ;;  %v646_v56 = vadd.f32 %v644_v51, %v640_v52 }
 0x204   :  { %v602_v55 = vpop.f32.mrf.mxu3 }
 0x205   :  { %v648_v57 = vadd.f32 %v642_v53, %v602_v55  ;;  %v650_v54 = vmul.f32 %v602_v55, %v602_v55 }
 0x207   :  { %v652_v58 = vadd.f32 %v650_v54, %v646_v56  ;;  %658 = vst [vmem:[#allocation10 + $0x8] sm:$0xff] %v648_v57 }
 0x209   :  { %665 = vst [vmem:[#allocation10 + $0x18] sm:$0xff] %v652_v58 }
 0x20a   :  { %678 = dma.vmem_to_hbm [thread:$0]  %s671_s17, 512, %s673_s20, [#allocation4], %s852_s27, %s852_s27, %s853_s28  }
 0x20b   :  { %846 = dma.done.wait [#allocation4], 512  }
 0x20c   :  { %847 = vsyncadd [#allocation4], 4294966784 }
 0x20d   :  { %683 = vsyncpa [#allocation3], 1 }
 0x20e   :  { %684 = vsyncpa [#allocation6], 1 }
 0x20f   :  { %685 = vsyncpa [#allocation9], 1 }
 0x210   :  { %686 = vsyncpa [#allocation4], 1 }

</bundles_post_ra>
